<compile_context>
chip_gen: v6e
topology: v6e:2x2x1
jax: 0.10.0
libtpu: 0.0.40
codegen_flags: <defaults>
</compile_context>

<pallas_src>
import functools

import jax
import jax.numpy as jnp
from jax.experimental import pallas as pl
from jax.experimental.pallas import tpu as pltpu


def _round_up(a, b):
    return (a + b - 1) // b * b


def _vmem_budget_bytes():
    """Generation-aware scoped-VMEM budget (leaves headroom for Mosaic scratch)."""
    cap = 64 << 20
    try:
        get_info = getattr(pltpu, "get_tpu_info", None)
        if get_info is not None:
            cap = int(getattr(get_info(), "vmem_capacity_bytes", cap))
    except Exception:
        pass
    if cap <= (64 << 20):                       # v7x-class: 64 MiB physical
        return int(cap * 0.80)                  # ~51 MiB scoped
    return min(int(cap * 0.85), 110 << 20)      # v5e/v6e: 128 MiB -> ~100-110 MiB


def _largest_hm_tiling(hm, cap):
    """Largest proper divisor of hm that is a multiple of 256 (fallback 128), <= cap."""
    for granule in (256, 128):
        t = min(cap, hm - granule)
        t = (t // granule) * granule
        while t >= granule:
            if hm % t == 0:
                return t
            t -= granule
    return None


def _ff_kernel_resident(x_ref, w1_ref, b1_ref, w2_ref, b2_ref, o_ref, *,
                        negative_slope, h_dtype):
    # Resident-weights path (thm == hm): no reduction axis, no accumulator.
    h = jnp.dot(x_ref[...], w1_ref[...], preferred_element_type=jnp.float32)
    h = h + b1_ref[...].astype(jnp.float32)
    h = jnp.where(h >= 0, h, negative_slope * h)          # LeakyReLU
    # Dropout: identity (eval / p=0).
    out = jnp.dot(h.astype(h_dtype), w2_ref[...],
                  preferred_element_type=jnp.float32)
    o_ref[...] = (out + b2_ref[...].astype(jnp.float32)).astype(o_ref.dtype)


def _ff_kernel_tiled(x_ref, w1_ref, b1_ref, w2_ref, b2_ref, o_ref, acc_ref, *,
                     negative_slope, h_dtype):
    # Grid: (token tiles, hm tiles).  hm is the reduction axis of the 2nd
    # matmul; x block and output block are resident across it.
    k = pl.program_id(1)

    @pl.when(k == 0)
    def _():
        acc_ref[...] = jnp.zeros_like(acc_ref)

    h = jnp.dot(x_ref[...], w1_ref[...], preferred_element_type=jnp.float32)
    h = h + b1_ref[...].astype(jnp.float32)
    h = jnp.where(h >= 0, h, negative_slope * h)          # LeakyReLU
    # Dropout: identity (eval / p=0).
    acc_ref[...] += jnp.dot(h.astype(h_dtype), w2_ref[...],
                            preferred_element_type=jnp.float32)

    @pl.when(k == pl.num_programs(1) - 1)
    def _():
        o_ref[...] = (acc_ref[...]
                      + b2_ref[...].astype(jnp.float32)).astype(o_ref.dtype)


def feed_forward(x, w1, b1, w2, b2, *, tile_n=512, tile_hm=2048,
                 negative_slope=0.01, compute_dtype=None):
    """x: [N, hidden]; w1: [hidden, hm]; b1: [hm]; w2: [hm, hidden]; b2: [hidden].

    Returns [N, hidden] in x.dtype.  `compute_dtype=jnp.bfloat16` runs the MXU
    in bf16 (f32 accumulation; the intermediate fed to the 2nd matmul is also
    bf16 -- documented precision tradeoff).  Passing tile_hm < hm explicitly
    requests hm (reduction) tiling; otherwise the kernel keeps the weights
    fully VMEM-resident when the budget allows.
    """
    N, hidden = x.shape
    hm = w1.shape[1]
    assert w1.shape == (hidden, hm)
    assert b1.shape == (hm,)
    assert w2.shape == (hm, hidden)
    assert b2.shape == (hidden,)

    out_dtype = x.dtype
    if compute_dtype is not None:
        x = x.astype(compute_dtype)
        w1 = w1.astype(compute_dtype)
        w2 = w2.astype(compute_dtype)
        h_dtype = compute_dtype
    else:
        h_dtype = jnp.float32          # keep intermediate in f32 for fp32 parity

    x_it = jnp.dtype(x.dtype).itemsize
    w_it = jnp.dtype(w1.dtype).itemsize
    o_it = jnp.dtype(out_dtype).itemsize
    h_it = jnp.dtype(h_dtype).itemsize

    budget = _vmem_budget_bytes()
    margin = 4 << 20                   # Mosaic internal scratch headroom

    # Token (M) tile: as big as VMEM allows (weight re-streaming, when hm is
    # tiled, scales as N/tn), multiple of 8 sublanes, clamped to N.
    tn = max(8, min(tile_n, _round_up(N, 8)) // 8 * 8)

    def est(tn_, thm_, tiled_k):
        e = 2 * tn_ * hidden * x_it            # x tile (double-buffered)
        e += 2 * hidden * thm_ * w_it          # w1 column tile
        e += 2 * thm_ * 4                      # b1 tile
        e += 2 * thm_ * hidden * w_it          # w2 row tile
        e += 2 * hidden * 4                    # b2
        e += 2 * tn_ * hidden * o_it           # out tile
        e += tn_ * thm_ * 4                    # materialized f32 intermediate h
        e += tn_ * thm_ * h_it                 # cast copy of h fed to 2nd matmul
        if tiled_k:
            e += tn_ * hidden * 4              # f32 accumulator scratch
        return e

    if tile_hm >= hm and est(tn, hm, False) + margin <= budget:
        thm = hm                               # weights fully resident
    else:
        t = _largest_hm_tiling(hm, min(tile_hm, hm))
        # TODO(synk): pad hm when it has no 128-multiple divisor instead of
        # falling back to a fully resident hm tile.
        thm = t if t is not None else hm
        while tn > 64 and est(tn, thm, thm < hm) + margin > budget:
            tn = max(64, (tn // 2) // 8 * 8)

    k_tiles = hm // thm
    n_tiles = -(-N // tn)                      # ragged last block: Pallas masks it

    vmem_limit = int(min(budget,
                         max(32 << 20, est(tn, thm, k_tiles > 1) + margin)))

    flops = 4 * N * hidden * hm                # two matmuls, 2*M*K*N each
    w_bytes = (w1.size + w2.size) * w_it
    bytes_accessed = (N * hidden * x_it + N * hidden * o_it
                      + w_bytes * (n_tiles if k_tiles > 1 else 1)
                      + hm * 4 + hidden * 4)

    b1_2d = b1.reshape(1, hm)
    b2_2d = b2.reshape(1, hidden)

    if k_tiles == 1:
        kernel = functools.partial(_ff_kernel_resident,
                                   negative_slope=negative_slope,
                                   h_dtype=h_dtype)
        grid_spec = pltpu.PrefetchScalarGridSpec(
            num_scalar_prefetch=0,
            grid=(n_tiles,),
            in_specs=[
                pl.BlockSpec((tn, hidden), lambda i: (i, 0)),      # x tile
                pl.BlockSpec((hidden, hm), lambda i: (0, 0)),      # w1 (resident)
                pl.BlockSpec((1, hm), lambda i: (0, 0)),           # b1
                pl.BlockSpec((hm, hidden), lambda i: (0, 0)),      # w2 (resident)
                pl.BlockSpec((1, hidden), lambda i: (0, 0)),       # b2
            ],
            out_specs=pl.BlockSpec((tn, hidden), lambda i: (i, 0)),
            scratch_shapes=[],
        )
        dims = ("parallel",)
    else:
        kernel = functools.partial(_ff_kernel_tiled,
                                   negative_slope=negative_slope,
                                   h_dtype=h_dtype)
        grid_spec = pltpu.PrefetchScalarGridSpec(
            num_scalar_prefetch=0,
            grid=(n_tiles, k_tiles),
            in_specs=[
                pl.BlockSpec((tn, hidden), lambda i, k: (i, 0)),   # x (resident over k)
                pl.BlockSpec((hidden, thm), lambda i, k: (0, k)),  # w1 column tile
                pl.BlockSpec((1, thm), lambda i, k: (0, k)),       # b1 tile
                pl.BlockSpec((thm, hidden), lambda i, k: (k, 0)),  # w2 row tile
                pl.BlockSpec((1, hidden), lambda i, k: (0, 0)),    # b2
            ],
            out_specs=pl.BlockSpec((tn, hidden), lambda i, k: (i, 0)),
            scratch_shapes=[pltpu.VMEM((tn, hidden), jnp.float32)],
        )
        dims = ("parallel", "arbitrary")

    return pl.pallas_call(
        kernel,
        out_shape=jax.ShapeDtypeStruct((N, hidden), out_dtype),
        grid_spec=grid_spec,
        compiler_params=pltpu.CompilerParams(
            dimension_semantics=dims, vmem_limit_bytes=vmem_limit),
        cost_estimate=pl.CostEstimate(flops=int(flops), transcendentals=0,
                                      bytes_accessed=int(bytes_accessed)),
    )(x, w1, b1_2d, w2, b2_2d)


def feed_forward_ref(x, w1, b1, w2, b2, negative_slope=0.01):
    h = x @ w1 + b1
    h = jnp.where(h >= 0, h, negative_slope * h)
    return h @ w2 + b2


if __name__ == "__main__":
    key = jax.random.PRNGKey(0)

    # --- Test 1: module-sized shapes (batch=2, seq=8, hidden=32, multi=1). ---
    hidden, multi = 32, 1
    batch, seq = 2, 8
    N = batch * seq
    hm = hidden * multi

    kx, k1, k2, k3, k4 = jax.random.split(key, 5)
    lim1 = 1.0 / jnp.sqrt(hidden)
    lim2 = 1.0 / jnp.sqrt(hm)
    w1 = jax.random.uniform(k1, (hidden, hm), jnp.float32, -lim1, lim1)
    b1 = jax.random.uniform(k2, (hm,), jnp.float32, -lim1, lim1)
    w2 = jax.random.uniform(k3, (hm, hidden), jnp.float32, -lim2, lim2)
    b2 = jax.random.uniform(k4, (hidden,), jnp.float32, -lim2, lim2)
    x = jax.random.normal(kx, (batch, seq, hidden), jnp.float32)
    x2d = x.reshape(N, hidden)

    out = jax.block_until_ready(feed_forward(x2d, w1, b1, w2, b2))
    ref = feed_forward_ref(x2d, w1, b1, w2, b2)
    assert out.shape == (N, hidden)
    assert jnp.allclose(out, ref, atol=1e-5, rtol=1e-5), "f32 mismatch vs ref"
    assert out.reshape(batch, seq, hidden).shape == (batch, seq, hidden)

    # bf16 compute path (MXU-native precision, f32 accumulation).
    out_bf16 = jax.block_until_ready(
        feed_forward(x2d, w1, b1, w2, b2, compute_dtype=jnp.bfloat16))
    assert jnp.allclose(out_bf16, ref, atol=1e-1, rtol=1e-1), "bf16 mismatch"

    # --- Test 2: ragged N (masked last tile) + forced hm reduction tiling. ---
    hidden2, multi2 = 32, 8
    N2 = 272                      # not a multiple of tile_n -> ragged last block
    hm2 = hidden2 * multi2        # 256 -> two hm tiles of 128 (tile_hm=128 < hm)
    k5, k6, k7, k8, k9 = jax.random.split(jax.random.PRNGKey(1), 5)
    w1b = jax.random.normal(k5, (hidden2, hm2), jnp.float32) * 0.05
    b1b = jax.random.normal(k6, (hm2,), jnp.float32) * 0.05
    w2b = jax.random.normal(k7, (hm2, hidden2), jnp.float32) * 0.05
    b2b = jax.random.normal(k8, (hidden2,), jnp.float32) * 0.05
    xb = jax.random.normal(k9, (N2, hidden2), jnp.float32)

    outb = jax.block_until_ready(
        feed_forward(xb, w1b, b1b, w2b, b2b, tile_n=128, tile_hm=128))
    refb = feed_forward_ref(xb, w1b, b1b, w2b, b2b)
    assert outb.shape == (N2, hidden2)
    assert jnp.allclose(outb, refb, atol=1e-4, rtol=1e-4), "tiled mismatch"

    print("KERNEL_OK")
</pallas_src>

<mosaic_0001>
module attributes {stable_mosaic.version = 11 : i64} {
  func.func @_ff_kernel_resident(%arg0: i32, %arg1: memref<16x32xf32, #tpu.memory_space<vmem>>, %arg2: memref<32x32xf32, #tpu.memory_space<vmem>>, %arg3: memref<1x32xf32, #tpu.memory_space<vmem>>, %arg4: memref<32x32xf32, #tpu.memory_space<vmem>>, %arg5: memref<1x32xf32, #tpu.memory_space<vmem>>, %arg6: memref<16x32xf32, #tpu.memory_space<vmem>>) attributes {dimension_semantics = [#tpu.dimension_semantics<parallel>], iteration_bounds = array<i64: 1>, scalar_prefetch = 0 : i64, scratch_operands = 0 : i64, tpu.core_type = #tpu.core_type<tc>, window_params = [{transform_indices = @transform_0, window_bounds = array<i64: 16, 32>}, {pipeline_mode = #tpu.pipeline_mode<synchronous>, transform_indices = @transform_1, window_bounds = array<i64: 32, 32>}, {pipeline_mode = #tpu.pipeline_mode<synchronous>, transform_indices = @transform_2, window_bounds = array<i64: 1, 32>}, {pipeline_mode = #tpu.pipeline_mode<synchronous>, transform_indices = @transform_3, window_bounds = array<i64: 32, 32>}, {pipeline_mode = #tpu.pipeline_mode<synchronous>, transform_indices = @transform_4, window_bounds = array<i64: 1, 32>}, {transform_indices = @transform_5, window_bounds = array<i64: 16, 32>}]} {
    %c0 = arith.constant 0 : index
    %c0_0 = arith.constant 0 : index
    %0 = vector.load %arg1[%c0, %c0_0] : memref<16x32xf32, #tpu.memory_space<vmem>>, vector<16x32xf32>
    %c0_1 = arith.constant 0 : index
    %c0_2 = arith.constant 0 : index
    %1 = vector.load %arg2[%c0_1, %c0_2] : memref<32x32xf32, #tpu.memory_space<vmem>>, vector<32x32xf32>
    %cst = arith.constant dense<0.000000e+00> : vector<16x32xf32>
    %2 = tpu.matmul %0, %1, %cst {dimension_numbers = #tpu.dot_dimension_numbers<[1], [0], [0], [1], [0, 0, 1, 1], [], []>} : vector<16x32xf32>, vector<32x32xf32>, vector<16x32xf32> -> vector<16x32xf32>
    %c0_3 = arith.constant 0 : index
    %c0_4 = arith.constant 0 : index
    %3 = vector.load %arg3[%c0_3, %c0_4] : memref<1x32xf32, #tpu.memory_space<vmem>>, vector<1x32xf32>
    %4 = vector.broadcast %3 : vector<1x32xf32> to vector<16x32xf32>
    %5 = arith.addf %2, %4 : vector<16x32xf32>
    %cst_5 = arith.constant 0.000000e+00 : f32
    %6 = vector.broadcast %cst_5 : f32 to vector<16x32xf32>
    %7 = arith.cmpf oge, %5, %6 : vector<16x32xf32>
    %cst_6 = arith.constant 0.00999999977 : f32
    %8 = vector.broadcast %cst_6 : f32 to vector<16x32xf32>
    %9 = arith.mulf %8, %5 : vector<16x32xf32>
    %10 = arith.select %7, %5, %9 : vector<16x32xi1>, vector<16x32xf32>
    %c0_7 = arith.constant 0 : index
    %c0_8 = arith.constant 0 : index
    %11 = vector.load %arg4[%c0_7, %c0_8] : memref<32x32xf32, #tpu.memory_space<vmem>>, vector<32x32xf32>
    %cst_9 = arith.constant dense<0.000000e+00> : vector<16x32xf32>
    %12 = tpu.matmul %10, %11, %cst_9 {dimension_numbers = #tpu.dot_dimension_numbers<[1], [0], [0], [1], [0, 0, 1, 1], [], []>} : vector<16x32xf32>, vector<32x32xf32>, vector<16x32xf32> -> vector<16x32xf32>
    %c0_10 = arith.constant 0 : index
    %c0_11 = arith.constant 0 : index
    %13 = vector.load %arg5[%c0_10, %c0_11] : memref<1x32xf32, #tpu.memory_space<vmem>>, vector<1x32xf32>
    %14 = vector.broadcast %13 : vector<1x32xf32> to vector<16x32xf32>
    %15 = arith.addf %12, %14 : vector<16x32xf32>
    %c0_12 = arith.constant 0 : index
    %c0_13 = arith.constant 0 : index
    %16 = vector.load %arg6[%c0_12, %c0_13] : memref<16x32xf32, #tpu.memory_space<vmem>>, vector<16x32xf32>
    tpu.vector_store %arg6[%c0_12, %c0_13], %15 {strides = array<i32>} : memref<16x32xf32, #tpu.memory_space<vmem>>, vector<16x32xf32>,
    return
  }
  func.func @transform_0(%arg0: i32) -> (i32, i32) {
    %c0_i32 = arith.constant 0 : i32
    %c0_i32_0 = arith.constant 0 : i32
    return %arg0, %c0_i32 : i32, i32
  }
  func.func @transform_1(%arg0: i32) -> (i32, i32) {
    %c0_i32 = arith.constant 0 : i32
    %c0_i32_0 = arith.constant 0 : i32
    %c0_i32_1 = arith.constant 0 : i32
    return %c0_i32, %c0_i32_0 : i32, i32
  }
  func.func @transform_2(%arg0: i32) -> (i32, i32) {
    %c0_i32 = arith.constant 0 : i32
    %c0_i32_0 = arith.constant 0 : i32
    %c0_i32_1 = arith.constant 0 : i32
    return %c0_i32, %c0_i32_0 : i32, i32
  }
  func.func @transform_3(%arg0: i32) -> (i32, i32) {
    %c0_i32 = arith.constant 0 : i32
    %c0_i32_0 = arith.constant 0 : i32
    %c0_i32_1 = arith.constant 0 : i32
    return %c0_i32, %c0_i32_0 : i32, i32
  }
  func.func @transform_4(%arg0: i32) -> (i32, i32) {
    %c0_i32 = arith.constant 0 : i32
    %c0_i32_0 = arith.constant 0 : i32
    %c0_i32_1 = arith.constant 0 : i32
    return %c0_i32, %c0_i32_0 : i32, i32
  }
  func.func @transform_5(%arg0: i32) -> (i32, i32) {
    %c0_i32 = arith.constant 0 : i32
    %c0_i32_0 = arith.constant 0 : i32
    return %arg0, %c0_i32 : i32, i32
  }
}

</mosaic_0001>

<bundles_post_ra>
// kernel: tpu_custom_call.1
= control target key start
LH: loop header
LB: loop body
LE: loop exit
PB: predicated region body
PF: predicated region fallthrough
CT: control target
= control target key end

     0   :  { %10 = vsyncpa [#allocation3], 0  ;;  %s479_s0 = inlined_call_operand.hbm [shape: f32[16,32], index: 0, kind: input, shape index: {}]   ;;  %s480_s1 = inlined_call_operand.hbm [shape: f32[32,32], index: 1, kind: input, shape index: {}]   ;;  %s481_s2 = inlined_call_operand.vmem [shape: f32[1,32], index: 2, kind: input, shape index: {}]   ;;  %s482_s3 = inlined_call_operand.hbm [shape: f32[32,32], index: 3, kind: input, shape index: {}]   ;;  %s483_s4 = inlined_call_operand.vmem [shape: f32[1,32], index: 4, kind: input, shape index: {}]   ;;  %s484_s5 = inlined_call_operand.hbm [shape: f32[16,32], index: 5, kind: output, shape index: {}]  }
   0x1   :  { %11 = vsyncpa [#allocation6], 0 }
   0x2   :  { %12 = vsyncpa [#allocation4], 0  ;;  %s407_s18 = smov [#allocation5]   ;;  %s408_s20 = smov [#allocation2]  }
   0x3   :  { %s30_s19 = sshll.u32 %s407_s18, 4  ;;  %s18_s21 = sshll.u32 %s408_s20, 4  ;;  %s31_s19 = int_to_ptr.vmem [resolvable:$true] %s30_s19  ;;  %s19_s21 = int_to_ptr.vmem [resolvable:$true] %s18_s21 }
   0x4   :  { %s329_s22 = scalar_lea.vmem %s31_s19, 512  ;;  %p334_p1 = scmp.lt.s32.totalorder %s31_s19, %s31_s19 }
   0x5   :  { %p330_p0 = scmp.ne.s32.totalorder %s31_s19, %s329_s22  ;;  %p335_p2 = scmp.lt.s32.totalorder %s329_s22, %s329_s22 }
   0x7   :  { %p336_p3 = por %p335_p2, %p334_p1 }
   0x9   :  { %p337_p4 = pnand %p336_p3, %p330_p0 }
   0xb   :  { %340 = shalt.err (!%p337_p4)
}
   0xc   :  { %s409_s23 = smov 128   ;;  %s410_s24 = smov 8  }
   0xd   :  { %36 = dma.hbm_to_vmem [thread:$0]  %s480_s1, 512, %s31_s19, [#allocation6], %s409_s23, %s409_s23, %s410_s24  }
   0xe   :  { %s349_s27 = scalar_lea.vmem %s19_s21, 256  ;;  %p354_p6 = scmp.lt.s32.totalorder %s19_s21, %s19_s21 }
   0xf   :  { %p350_p5 = scmp.ne.s32.totalorder %s19_s21, %s349_s27  ;;  %p355_p7 = scmp.lt.s32.totalorder %s349_s27, %s349_s27 }
  0x11   :  { %p356_p8 = por %p355_p7, %p354_p6 }
  0x13   :  { %p357_p9 = pnand %p356_p8, %p350_p5 }
  0x15   :  { %360 = shalt.err (!%p357_p9)
}
  0x16   :  { %24 = dma.hbm_to_vmem [thread:$0]  %s479_s0, 256, %s19_s21, [#allocation3], %s409_s23, %s409_s23, %s410_s24  }
  0x17   :  { %s411_s30 = smov [#allocation7]  }
  0x18   :  { %s44_s6 = sshll.u32 %s411_s30, 4  ;;  %s45_s6 = int_to_ptr.vmem [resolvable:$true] %s44_s6 }
  0x19   :  { %s369_s7 = scalar_lea.vmem %s45_s6, 512  ;;  %p374_p11 = scmp.lt.s32.totalorder %s45_s6, %s45_s6 }
  0x1a   :  { %p370_p10 = scmp.ne.s32.totalorder %s45_s6, %s369_s7  ;;  %p375_p12 = scmp.lt.s32.totalorder %s369_s7, %s369_s7 }
  0x1c   :  { %p376_p13 = por %p375_p12, %p374_p11 }
  0x1e   :  { %p377_p0 = pnand %p376_p13, %p370_p10 }
  0x20   :  { %380 = shalt.err (!%p377_p0)
}
  0x21   :  { %50 = dma.hbm_to_vmem [thread:$0]  %s482_s3, 512, %s45_s6, [#allocation6], %s409_s23, %s409_s23, %s410_s24  }
  0x22   :  { %401 = dma.done.wait [#allocation3], 256  }
  0x23   :  { %402 = vsyncadd [#allocation3], 4294967040 }
  0x24   :  { %403 = dma.done.wait [#allocation6], 1024  }
  0x25   :  { %404 = vsyncadd [#allocation6], 4294966272  ;;  %vm75_vm0 = vcmask 261120   ;;  %v67_v0 = vld [vmem:[#allocation5 + $0x18] sm:$0xff]  ;;  %v66_v1 = vld [vmem:[#allocation5 + $0x10] sm:$0xff] }
  0x26   :  { %293 = vmatprep.subr.mxu0 %v67_v0  ;;  %v62_v2 = vld [vmem:[#allocation2] sm:$0xff]  ;;  %v65_v3 = vld [vmem:[#allocation5 + $0x8] sm:$0xff]  ;;  %v64_v4 = vld [vmem:[#allocation5] sm:$0xff] }
  0x27   :  { %294 = vmatpush3.msra.mxu0 %v67_v0  ;;  %301 = vmatprep.mubr.msk.f32.mxu0 %vm75_vm0, %v62_v2  ;;  %v63_v5 = vld [vmem:[#allocation2 + $0x8] sm:$0xff]  ;;  %v165_v7 = vld [vmem:[#allocation7 + $0x10] sm:$0xff]  ;;  %v164_v8 = vld [vmem:[#allocation7 + $0x8] sm:$0xff] }
  0x28   :  { %295 = vmatprep.subr.mxu0 %v66_v1  ;;  %v166_v6 = vld [vmem:[#allocation7 + $0x18] sm:$0xff]  ;;  %v163_v9 = vld [vmem:[#allocation7] sm:$0xff]  ;;  %v275_v10 = vld [vmem:[%s481_s2] ss:$0 sm:$0xff]  ;;  %s412_s2 = smov [#allocation8]  }
  0x29   :  { %296 = vmatpush3.msra.mxu0 %v66_v1  ;;  %304 = vmatprep.subr.mxu1 %v166_v6  ;;  %v278_v19 = vld [vmem:[%s483_s4] ss:$0 sm:$0xff]  ;;  %s262_s11 = sshll.u32 %s412_s2, 4  ;;  %s263_s11 = int_to_ptr.vmem [resolvable:$true] %s262_s11 }
  0x2a   :  { %297 = vmatprep.subr.mxu0 %v65_v3  ;;  %305 = vmatpush3.msra.mxu1 %v166_v6  ;;  %s381_s12 = scalar_lea.vmem %s263_s11, 256  ;;  %p386_p2 = scmp.lt.s32.totalorder %s263_s11, %s263_s11 }
  0x2b   :  { %298 = vmatpush3.msra.mxu0 %v65_v3  ;;  %306 = vmatprep.subr.mxu1 %v165_v7  ;;  %p382_p1 = scmp.ne.s32.totalorder %s263_s11, %s381_s12  ;;  %p387_p3 = scmp.lt.s32.totalorder %s381_s12, %s381_s12 }
  0x2c   :  { %299 = vmatprep.subr.mxu0 %v64_v4  ;;  %307 = vmatpush3.msra.mxu1 %v165_v7 }
  0x2d   :  { %300 = vmatpush3.msra.mxu0 %v64_v4  ;;  %308 = vmatprep.subr.mxu1 %v164_v8  ;;  %p388_p4 = por %p387_p3, %p386_p2 }
  0x2e   :  { %302 = vmatmul.mubr.msk.f32.vlgmr.msra.gmra.mxu0 %vm75_vm0, %v63_v5  ;;  %309 = vmatpush3.msra.mxu1 %v164_v8 }
  0x2f   :  { %310 = vmatprep.subr.mxu1 %v163_v9  ;;  %p389_p5 = pnand %p388_p4, %p382_p1 }
  0x30   :  { %311 = vmatpush3.msra.mxu1 %v163_v9 }
  0xee   :  { %v303_v11 = vpop.f32.mrf.mxu0 }
  0xef   :  { %v154_v12 = vadd.f32 %v303_v11, %v275_v10 }
  0xf0   :  { %v148_v13 = vpop.f32.mrf.mxu0 }
  0xf1   :  { %v149_v14 = vadd.f32 %v275_v10, %v148_v13  ;;  %v160_v15 = vmul.f32 0.01, %v154_v12  ;;  %vm158_vm1 = vcmp.ge.f32.partialorder %v154_v12, 0.0 }
  0xf3   :  { %vm157_vm2 = vcmp.ge.f32.partialorder %v149_v14, 0.0  ;;  %v159_v16 = vmul.f32 0.01, %v149_v14  ;;  %v162_v18 = vsel %vm158_vm1, %v154_v12, %v160_v15 }
  0xf5   :  { %v161_v17 = vsel %vm157_vm2, %v149_v14, %v159_v16 }
  0xf6   :  { %312 = vmatprep.mubr.msk.f32.mxu1 %vm75_vm0, %v161_v17 }
  0xf7   :  { %313 = vmatmul.mubr.msk.f32.vlgmr.msra.gmra.mxu1 %vm75_vm0, %v162_v18 }
 0x1b7   :  { %v314_v20 = vpop.f32.mrf.mxu1 }
 0x1b8   :  { %v252_v21 = vadd.f32 %v314_v20, %v278_v19 }
 0x1b9   :  { %v246_v22 = vpop.f32.mrf.mxu1 }
 0x1ba   :  { %256 = vst.msk [vmem:[#allocation8 + $0x8] sm:$0xff] %vm75_vm0, %v252_v21  ;;  %v247_v23 = vadd.f32 %v278_v19, %v246_v22 }
 0x1bc   :  { %255 = vst.msk [vmem:[#allocation8] sm:$0xff] %vm75_vm0, %v247_v23 }
 0x1bd   :  { %392 = shalt.err (!%p389_p5)
}
 0x1be   :  { %268 = dma.vmem_to_hbm [thread:$0]  %s263_s11, 256, %s484_s5, [#allocation4], %s409_s23, %s409_s23, %s410_s24  }
 0x1bf   :  { %405 = dma.done.wait [#allocation4], 256  }
 0x1c0   :  { %406 = vsyncadd [#allocation4], 4294967040 }
 0x1c1   :  { %272 = vsyncpa [#allocation3], 1 }
 0x1c2   :  { %273 = vsyncpa [#allocation6], 1 }
 0x1c3   :  { %274 = vsyncpa [#allocation4], 1 }

</bundles_post_ra>
